<compile_context>
chip_gen: v5e
topology: v5e:2x2
jax: 0.10.0
libtpu: 0.0.40
codegen_flags: <defaults>
</compile_context>

<pallas_src>
import functools

import jax
import jax.numpy as jnp
from jax.experimental import pallas as pl
from jax.experimental.pallas import tpu as pltpu


# --------------------------------------------------------------------------
# Kernel
# --------------------------------------------------------------------------
def _batchnorm_kernel(x_ref, gamma_ref, beta_ref, rmean_ref, rvar_ref,
                      out_ref, new_rmean_ref, new_rvar_ref, *, eps, momentum):
    x = x_ref[...].astype(jnp.float32)          # (N, TF)
    gamma = gamma_ref[...]                      # (1, TF) f32
    beta = beta_ref[...]                        # (1, TF) f32

    # Per-feature-column batch statistics (reduction over the sublane axis).
    batch_mean = jnp.mean(x, axis=0, keepdims=True)                   # (1, TF)
    centered = x - batch_mean
    batch_var = jnp.mean(centered * centered, axis=0, keepdims=True)  # biased

    # Fused scale/bias: rsqrt uses the EUP slot; only mul+add on the big tile.
    inv_std = jax.lax.rsqrt(batch_var + eps)    # (1, TF)
    scale = gamma * inv_std                     # (1, TF)
    bias = beta - batch_mean * scale            # (1, TF)
    out_ref[...] = (x * scale + bias).astype(out_ref.dtype)

    # Running-stat update (tiny (1, TF) rows).
    new_rmean_ref[...] = momentum * batch_mean + (1.0 - momentum) * rmean_ref[...]
    new_rvar_ref[...] = momentum * batch_var + (1.0 - momentum) * rvar_ref[...]


# --------------------------------------------------------------------------
# Wrapper
# --------------------------------------------------------------------------
def _round_up(x, m):
    return ((x + m - 1) // m) * m


def _choose_feature_tiling(n, f, max_tile):
    """Returns (tile_width, padded_feature_width)."""
    # VMEM budget: double-buffered (N, TF) input + output blocks plus f32
    # temporaries ~ 6 slabs of N*TF*4 bytes.  Stay well under the scoped VMEM
    # limit on every generation (v7x has only 64 MiB physical per TC).
    budget_bytes = 18 * 1024 * 1024
    cap = max(128, (budget_bytes // (6 * max(n, 1) * 4)) // 128 * 128)
    cap = min(cap, max_tile)

    if f <= cap:
        # Single tile covering the full feature extent -> no padding at all.
        return f, f

    fp = _round_up(f, 128)
    tf = 128
    for cand in range(cap, 127, -128):          # largest lane-dense divisor
        if fp % cand == 0:
            tf = cand
            break
    return tf, fp


@functools.partial(jax.jit,
                   static_argnames=("eps", "momentum", "max_feature_tile"))
def batch_norm_train(x, gamma, beta, running_mean, running_var,
                     eps=1e-5, momentum=0.1, max_feature_tile=512):
    """Training-mode BatchNorm over dim 0 of a (N, F) input.

    Returns (out, new_running_mean, new_running_var).
    """
    n, f = x.shape
    tf, fp = _choose_feature_tiling(n, f, max_feature_tile)

    # --- present lane-dense (1, Fp) parameter rows / padded x --------------
    def pad_row(a, pad_value):
        a = a.reshape(1, f).astype(jnp.float32)
        if fp != f:
            a = jnp.pad(a, ((0, 0), (0, fp - f)), constant_values=pad_value)
        return a

    xp = x if fp == f else jnp.pad(x, ((0, 0), (0, fp - f)))
    gamma2 = pad_row(gamma, 1.0)
    beta2 = pad_row(beta, 0.0)
    rmean2 = pad_row(running_mean, 0.0)
    rvar2 = pad_row(running_var, 1.0)   # var=1 in padding keeps rsqrt benign

    kernel = functools.partial(_batchnorm_kernel, eps=eps, momentum=momentum)

    x_spec = pl.BlockSpec((n, tf), lambda j: (0, j))
    row_spec = pl.BlockSpec((1, tf), lambda j: (0, j))

    itemsize = jnp.dtype(x.dtype).itemsize
    cost = pl.CostEstimate(
        flops=8 * n * fp,                 # sub/mul/add + reduction work
        transcendentals=fp,               # one rsqrt per feature column
        bytes_accessed=2 * n * fp * itemsize + 7 * fp * 4,
    )

    out, new_rmean, new_rvar = pl.pallas_call(
        kernel,
        grid=(fp // tf,),
        in_specs=[x_spec, row_spec, row_spec, row_spec, row_spec],
        out_specs=[x_spec, row_spec, row_spec],
        out_shape=(
            jax.ShapeDtypeStruct((n, fp), x.dtype),
            jax.ShapeDtypeStruct((1, fp), jnp.float32),
            jax.ShapeDtypeStruct((1, fp), jnp.float32),
        ),
        # Tiny stat rows are updated in place instead of fresh HBM buffers.
        input_output_aliases={3: 1, 4: 2},
        compiler_params=pltpu.CompilerParams(
            dimension_semantics=("parallel",),
            vmem_limit_bytes=48 * 1024 * 1024,
        ),
        cost_estimate=cost,
    )(xp, gamma2, beta2, rmean2, rvar2)

    if fp != f:
        out = out[:, :f]
    return out, new_rmean[0, :f], new_rvar[0, :f]


# --------------------------------------------------------------------------
# Reference + tests
# --------------------------------------------------------------------------
def _reference(x, gamma, beta, running_mean, running_var, eps, momentum):
    batch_mean = jnp.mean(x, axis=0)
    batch_var = jnp.mean((x - batch_mean) ** 2, axis=0)   # unbiased=False
    x_hat = (x - batch_mean) / jnp.sqrt(batch_var + eps)
    out = gamma * x_hat + beta
    new_rm = momentum * batch_mean + (1 - momentum) * running_mean
    new_rv = momentum * batch_var + (1 - momentum) * running_var
    return out, new_rm, new_rv


def _run_case(key, n, f, eps=1e-5, momentum=0.1):
    kx, km, kv = jax.random.split(key, 3)
    x = jax.random.normal(kx, (n, f), dtype=jnp.float32)
    gamma = jnp.ones((f,), jnp.float32)
    beta = jnp.zeros((f,), jnp.float32)
    running_mean = 0.1 * jax.random.normal(km, (f,), dtype=jnp.float32)
    running_var = 1.0 + 0.1 * jax.random.uniform(kv, (f,), dtype=jnp.float32)

    out, new_rm, new_rv = batch_norm_train(
        x, gamma, beta, running_mean, running_var, eps=eps, momentum=momentum)
    jax.block_until_ready((out, new_rm, new_rv))

    ref_out, ref_rm, ref_rv = _reference(
        x, gamma, beta, running_mean, running_var, eps, momentum)
    assert jnp.allclose(out, ref_out, atol=1e-5, rtol=1e-5)
    assert jnp.allclose(new_rm, ref_rm, atol=1e-6, rtol=1e-6)
    assert jnp.allclose(new_rv, ref_rv, atol=1e-6, rtol=1e-6)


if __name__ == "__main__":
    key = jax.random.PRNGKey(0)
    k1, k2, k3 = jax.random.split(key, 3)

    # Small demo shape consistent with the module (batch=8, num_features=32):
    # single full-extent tile, no padding.
    _run_case(k1, n=8, f=32)

    # F multiple of 128 and larger than the tile cap: lane-dense multi-tile
    # feature grid (640 -> 5 tiles of 128), no padding.
    _run_case(k2, n=16, f=640)

    # Unaligned F larger than the tile cap: padded to 1536, 3 tiles of 512.
    _run_case(k3, n=8, f=1500)

    print("KERNEL_OK")
</pallas_src>

<mosaic_0001>
module attributes {stable_mosaic.version = 11 : i64} {
  func.func @_batchnorm_kernel(%arg0: i32, %arg1: memref<8x32xf32, #tpu.memory_space<vmem>>, %arg2: memref<1x32xf32, #tpu.memory_space<vmem>>, %arg3: memref<1x32xf32, #tpu.memory_space<vmem>>, %arg4: memref<1x32xf32, #tpu.memory_space<vmem>>, %arg5: memref<1x32xf32, #tpu.memory_space<vmem>>, %arg6: memref<8x32xf32, #tpu.memory_space<vmem>>, %arg7: memref<1x32xf32, #tpu.memory_space<vmem>>, %arg8: memref<1x32xf32, #tpu.memory_space<vmem>>) attributes {dimension_semantics = [#tpu.dimension_semantics<parallel>], iteration_bounds = array<i64: 1>, scalar_prefetch = 0 : i64, scratch_operands = 0 : i64, tpu.core_type = #tpu.core_type<tc>, window_params = [{transform_indices = @transform_0, window_bounds = array<i64: 8, 32>}, {transform_indices = @transform_1, window_bounds = array<i64: 1, 32>}, {transform_indices = @transform_2, window_bounds = array<i64: 1, 32>}, {transform_indices = @transform_3, window_bounds = array<i64: 1, 32>}, {transform_indices = @transform_4, window_bounds = array<i64: 1, 32>}, {transform_indices = @transform_5, window_bounds = array<i64: 8, 32>}, {transform_indices = @transform_6, window_bounds = array<i64: 1, 32>}, {transform_indices = @transform_7, window_bounds = array<i64: 1, 32>}]} {
    %c0 = arith.constant 0 : index
    %c0_0 = arith.constant 0 : index
    %0 = vector.load %arg1[%c0, %c0_0] : memref<8x32xf32, #tpu.memory_space<vmem>>, vector<8x32xf32>
    %c0_1 = arith.constant 0 : index
    %c0_2 = arith.constant 0 : index
    %1 = vector.load %arg2[%c0_1, %c0_2] : memref<1x32xf32, #tpu.memory_space<vmem>>, vector<1x32xf32>
    %c0_3 = arith.constant 0 : index
    %c0_4 = arith.constant 0 : index
    %2 = vector.load %arg3[%c0_3, %c0_4] : memref<1x32xf32, #tpu.memory_space<vmem>>, vector<1x32xf32>
    %cst = arith.constant dense<0.000000e+00> : vector<32xf32>
    %3 = vector.multi_reduction <add>, %0, %cst [0] : vector<8x32xf32> to vector<32xf32>
    %4 = vector.shape_cast %3 : vector<32xf32> to vector<1x32xf32>
    %cst_5 = arith.constant 8.000000e+00 : f32
    %5 = vector.broadcast %cst_5 : f32 to vector<1x32xf32>
    %6 = arith.divf %4, %5 : vector<1x32xf32>
    %7 = vector.broadcast %6 : vector<1x32xf32> to vector<8x32xf32>
    %8 = arith.subf %0, %7 : vector<8x32xf32>
    %9 = arith.mulf %8, %8 : vector<8x32xf32>
    %cst_6 = arith.constant dense<0.000000e+00> : vector<32xf32>
    %10 = vector.multi_reduction <add>, %9, %cst_6 [0] : vector<8x32xf32> to vector<32xf32>
    %11 = vector.shape_cast %10 : vector<32xf32> to vector<1x32xf32>
    %cst_7 = arith.constant 8.000000e+00 : f32
    %12 = vector.broadcast %cst_7 : f32 to vector<1x32xf32>
    %13 = arith.divf %11, %12 : vector<1x32xf32>
    %cst_8 = arith.constant 9.99999974E-6 : f32
    %14 = vector.broadcast %cst_8 : f32 to vector<1x32xf32>
    %15 = arith.addf %13, %14 : vector<1x32xf32>
    %16 = math.rsqrt %15 : vector<1x32xf32>
    %17 = arith.mulf %1, %16 : vector<1x32xf32>
    %18 = arith.mulf %6, %17 : vector<1x32xf32>
    %19 = arith.subf %2, %18 : vector<1x32xf32>
    %20 = vector.broadcast %17 : vector<1x32xf32> to vector<8x32xf32>
    %21 = arith.mulf %0, %20 : vector<8x32xf32>
    %22 = vector.broadcast %19 : vector<1x32xf32> to vector<8x32xf32>
    %23 = arith.addf %21, %22 : vector<8x32xf32>
    %c0_9 = arith.constant 0 : index
    %c0_10 = arith.constant 0 : index
    %24 = vector.load %arg6[%c0_9, %c0_10] : memref<8x32xf32, #tpu.memory_space<vmem>>, vector<8x32xf32>
    tpu.vector_store %arg6[%c0_9, %c0_10], %23 {strides = array<i32>} : memref<8x32xf32, #tpu.memory_space<vmem>>, vector<8x32xf32>,
    %cst_11 = arith.constant 1.000000e-01 : f32
    %25 = vector.broadcast %cst_11 : f32 to vector<1x32xf32>
    %26 = arith.mulf %25, %6 : vector<1x32xf32>
    %c0_12 = arith.constant 0 : index
    %c0_13 = arith.constant 0 : index
    %27 = vector.load %arg4[%c0_12, %c0_13] : memref<1x32xf32, #tpu.memory_space<vmem>>, vector<1x32xf32>
    %cst_14 = arith.constant 0.899999976 : f32
    %28 = vector.broadcast %cst_14 : f32 to vector<1x32xf32>
    %29 = arith.mulf %28, %27 : vector<1x32xf32>
    %30 = arith.addf %26, %29 : vector<1x32xf32>
    %c0_15 = arith.constant 0 : index
    %c0_16 = arith.constant 0 : index
    %31 = vector.load %arg7[%c0_15, %c0_16] : memref<1x32xf32, #tpu.memory_space<vmem>>, vector<1x32xf32>
    tpu.vector_store %arg7[%c0_15, %c0_16], %30 {strides = array<i32>} : memref<1x32xf32, #tpu.memory_space<vmem>>, vector<1x32xf32>,
    %cst_17 = arith.constant 1.000000e-01 : f32
    %32 = vector.broadcast %cst_17 : f32 to vector<1x32xf32>
    %33 = arith.mulf %32, %13 : vector<1x32xf32>
    %c0_18 = arith.constant 0 : index
    %c0_19 = arith.constant 0 : index
    %34 = vector.load %arg5[%c0_18, %c0_19] : memref<1x32xf32, #tpu.memory_space<vmem>>, vector<1x32xf32>
    %cst_20 = arith.constant 0.899999976 : f32
    %35 = vector.broadcast %cst_20 : f32 to vector<1x32xf32>
    %36 = arith.mulf %35, %34 : vector<1x32xf32>
    %37 = arith.addf %33, %36 : vector<1x32xf32>
    %c0_21 = arith.constant 0 : index
    %c0_22 = arith.constant 0 : index
    %38 = vector.load %arg8[%c0_21, %c0_22] : memref<1x32xf32, #tpu.memory_space<vmem>>, vector<1x32xf32>
    tpu.vector_store %arg8[%c0_21, %c0_22], %37 {strides = array<i32>} : memref<1x32xf32, #tpu.memory_space<vmem>>, vector<1x32xf32>,
    return
  }
  func.func @transform_0(%arg0: i32) -> (i32, i32) {
    %c0_i32 = arith.constant 0 : i32
    %c0_i32_0 = arith.constant 0 : i32
    return %c0_i32, %arg0 : i32, i32
  }
  func.func @transform_1(%arg0: i32) -> (i32, i32) {
    %c0_i32 = arith.constant 0 : i32
    %c0_i32_0 = arith.constant 0 : i32
    return %c0_i32, %arg0 : i32, i32
  }
  func.func @transform_2(%arg0: i32) -> (i32, i32) {
    %c0_i32 = arith.constant 0 : i32
    %c0_i32_0 = arith.constant 0 : i32
    return %c0_i32, %arg0 : i32, i32
  }
  func.func @transform_3(%arg0: i32) -> (i32, i32) {
    %c0_i32 = arith.constant 0 : i32
    %c0_i32_0 = arith.constant 0 : i32
    return %c0_i32, %arg0 : i32, i32
  }
  func.func @transform_4(%arg0: i32) -> (i32, i32) {
    %c0_i32 = arith.constant 0 : i32
    %c0_i32_0 = arith.constant 0 : i32
    return %c0_i32, %arg0 : i32, i32
  }
  func.func @transform_5(%arg0: i32) -> (i32, i32) {
    %c0_i32 = arith.constant 0 : i32
    %c0_i32_0 = arith.constant 0 : i32
    return %c0_i32, %arg0 : i32, i32
  }
  func.func @transform_6(%arg0: i32) -> (i32, i32) {
    %c0_i32 = arith.constant 0 : i32
    %c0_i32_0 = arith.constant 0 : i32
    return %c0_i32, %arg0 : i32, i32
  }
  func.func @transform_7(%arg0: i32) -> (i32, i32) {
    %c0_i32 = arith.constant 0 : i32
    %c0_i32_0 = arith.constant 0 : i32
    return %c0_i32, %arg0 : i32, i32
  }
}

</mosaic_0001>

<bundles_post_ra>
// kernel: batch_norm_train.1
= control target key start
LH: loop header
LB: loop body
LE: loop exit
PB: predicated region body
PF: predicated region fallthrough
CT: control target
= control target key end

     0   :  { %13 = vsyncpa [#allocation3], 0  ;;  %s255_s0 = inlined_call_operand.vmem [shape: f32[8,32], index: 0, kind: input, shape index: {}]   ;;  %s256_s1 = inlined_call_operand.vmem [shape: f32[1,32], index: 1, kind: input, shape index: {}]   ;;  %s257_s2 = inlined_call_operand.hbm [shape: f32[1,32], index: 2, kind: input, shape index: {}]   ;;  %s258_s3 = inlined_call_operand.vmem [shape: f32[1,32], index: 3, kind: input, shape index: {}, may-alias: {3,6}]   ;;  %s259_s4 = inlined_call_operand.vmem [shape: f32[1,32], index: 4, kind: input, shape index: {}, may-alias: {4,7}]   ;;  %s260_s5 = inlined_call_operand.hbm [shape: f32[8,32], index: 5, kind: output, shape index: {0}]   ;;  %s261_s6 = inlined_call_operand.vmem [shape: f32[1,32], index: 6, kind: output, shape index: {1}, may-alias: {3,6}]   ;;  %s262_s7 = inlined_call_operand.vmem [shape: f32[1,32], index: 7, kind: output, shape index: {2}, may-alias: {4,7}]  }
   0x1   :  { %14 = vsyncpa [#allocation4], 0  ;;  %s24_s26 = sshll.u32 %s257_s2, 4  ;;  %s185_s27 = smov [#allocation2]   ;;  %s25_s26 = int_to_ptr.hbm [resolvable:$true] %s24_s26 }
   0x2   :  { %s26_s28 = sshll.u32 %s185_s27, 4  ;;  %s27_s28 = int_to_ptr.vmem [resolvable:$true] %s26_s28 }
   0x3   :  { %29 = dma.hbm_to_vmem [thread:$0]  %s25_s26, 16, %s27_s28, [#allocation3]  }
   0x4   :  { %181 = dma.done.wait [#allocation3], 16  }
   0x5   :  { %182 = vsyncadd [#allocation3], 4294967280  ;;  %v186_v0 = vmov 8.0   ;;  %vm41_vm0 = vcmask 261120   ;;  %v38_v2 = vld [vmem:[%s255_s0] sm:$0xff]  ;;  %vm94_vm2 = vcmask 253952  }
   0x6   :  { %129 = vrcp.f32 %v186_v0  ;;  %v42_v3 = vsel %vm41_vm0, %v38_v2, 0.0  ;;  %v91_v24 = vld [vmem:[%s258_s3] sm:$0x1]  ;;  %s108_s16 = sshll.u32 %s260_s5, 4  ;;  %s109_s16 = int_to_ptr.hbm [resolvable:$true] %s108_s16 }
   0x7   :  { %v43_v5 = vrot.slane %v42_v3, 4  ;;  %v92_v26 = vmul.f32 0.9, %v91_v24  ;;  %v97_v27 = vld [vmem:[%s259_s4] sm:$0x1] }
   0x8   :  { %v98_v31 = vmul.f32 0.9, %v97_v27  ;;  %v39_v40 = vld [vmem:[%s256_s1] sm:$0x1] }
   0x9   :  { %v44_v7 = vadd.f32 %v43_v5, %v42_v3  ;;  %v40_v44 = vld [vmem:[#allocation2] sm:$0x1] }
   0xb   :  { %v45_v9 = vrot.slane %v44_v7, 2 }
   0xc   :  { %v130_v1 = vpop.eup %129 }
   0xd   :  { %v50_v4 = vmul.f32 8.0, %v130_v1  ;;  %v46_v11 = vadd.f32 %v45_v9, %v44_v7  ;;  %vm54_vm1 = vweird.f32 %v130_v1 }
   0xf   :  { %v51_v6 = vsub.f32 1.0, %v50_v4  ;;  %v47_v12 = vrot.slane %v46_v11, 1 }
  0x11   :  { %v52_v8 = vmul.f32 %v130_v1, %v51_v6  ;;  %v48_v14 = vadd.f32 %v47_v12, %v46_v11 }
  0x13   :  { %v53_v10 = vadd.f32 %v130_v1, %v52_v8 }
  0x15   :  { %v55_v13 = vsel %vm54_vm1, %v130_v1, %v53_v10 }
  0x16   :  { %v56_v15 = vmul.f32 %v55_v13, %v48_v14 }
  0x18   :  { %v57_v16 = vsub.f32 %v38_v2, %v56_v15  ;;  %v90_v25 = vmul.f32 0.1, %v56_v15 }
  0x1a   :  { %v58_v17 = vmul.f32 %v57_v16, %v57_v16  ;;  %v93_v29 = vadd.f32 %v92_v26, %v90_v25 }
  0x1c   :  { %v59_v18 = vsel %vm41_vm0, %v58_v17, 0.0  ;;  %95 = vst.msk [vmem:[%s261_s6] sm:$0x1] %vm94_vm2, %v93_v29  ;;  %s187_s6 = smov [#allocation5]  }
  0x1d   :  { %v60_v19 = vrot.slane %v59_v18, 4 }
  0x1f   :  { %v61_v20 = vadd.f32 %v60_v19, %v59_v18 }
  0x21   :  { %v62_v21 = vrot.slane %v61_v20, 2 }
  0x23   :  { %v63_v22 = vadd.f32 %v62_v21, %v61_v20 }
  0x25   :  { %v64_v23 = vrot.slane %v63_v22, 1 }
  0x27   :  { %v65_v28 = vadd.f32 %v64_v23, %v63_v22 }
  0x29   :  { %v66_v30 = vmul.f32 %v65_v28, %v55_v13 }
  0x2b   :  { %v67_v32 = vadd.f32 1e-05, %v66_v30  ;;  %v96_v33 = vmul.f32 0.1, %v66_v30 }
  0x2d   :  { %131 = vrsqrt.f32 %v67_v32  ;;  %v99_v34 = vadd.f32 %v98_v31, %v96_v33  ;;  %vm74_vm3 = vweird.f32 %v67_v32 }
  0x2f   :  { %100 = vst.msk [vmem:[%s262_s7] sm:$0x1] %vm94_vm2, %v99_v34  ;;  %s106_s7 = sshll.u32 %s187_s6, 4  ;;  %s107_s7 = int_to_ptr.vmem [resolvable:$true] %s106_s7 }
  0x33   :  { %v132_v35 = vpop.eup %131 }
  0x34   :  { %v69_v36 = vmul.f32 %v132_v35, %v67_v32  ;;  %vm75_vm4 = vweird.f32 %v132_v35 }
  0x35   :  { %vm76_vm5 = vmor %vm74_vm3, %vm75_vm4 }
  0x36   :  { %v70_v37 = vmul.f32 %v132_v35, %v69_v36 }
  0x38   :  { %v71_v38 = vmul.f32 0.5, %v70_v37 }
  0x3a   :  { %v72_v39 = vsub.f32 1.5, %v71_v38 }
  0x3c   :  { %v73_v41 = vmul.f32 %v132_v35, %v72_v39 }
  0x3e   :  { %v77_v42 = vsel %vm76_vm5, %v132_v35, %v73_v41 }
  0x3f   :  { %v78_v43 = vmul.f32 %v77_v42, %v39_v40 }
  0x41   :  { %v79_v45 = vmul.f32 %v78_v43, %v56_v15  ;;  %v82_v46 = vperm.slane %v78_v43, 0 }
  0x43   :  { %v80_v47 = vsub.f32 %v40_v44, %v79_v45  ;;  %v84_v48 = vmul.f32 %v82_v46, %v38_v2 }
  0x45   :  { %v86_v49 = vperm.slane %v80_v47, 0 }
  0x47   :  { %v88_v50 = vadd.f32 %v86_v49, %v84_v48 }
  0x49   :  { %89 = vst.msk [vmem:[#allocation5] sm:$0xff] %vm41_vm0, %v88_v50 }
  0x4a   :  { %111 = dma.vmem_to_hbm [thread:$0]  %s107_s7, 128, %s109_s16, [#allocation4]  }
  0x4b   :  { %183 = dma.done.wait [#allocation4], 128  }
  0x4c   :  { %184 = vsyncadd [#allocation4], 4294967168 }
  0x4d   :  { %124 = vsyncpa [#allocation3], 1 }
  0x4e   :  { %125 = vsyncpa [#allocation4], 1 }

</bundles_post_ra>
